<compile_context>
chip_gen: v7x
topology: tpu7x:2x2x1
jax: 0.10.0
libtpu: 0.0.40
codegen_flags: <defaults>
</compile_context>

<pallas_src>
import math

import jax
import jax.numpy as jnp
from jax.experimental import pallas as pl
from jax.experimental.pallas import tpu as pltpu

_LANE = 128  # TPU lane width — keep the class (output) dimension lane-dense.


def _round_up(n, m):
    return ((n + m - 1) // m) * m


def _vmem_budget_bytes():
    """Per-generation scoped-VMEM budget (~3/4 of physical VMEM).

    v5e/v6e: 128 MiB physical -> ~96 MiB budget; v7x: 64 MiB -> 48 MiB.
    Falls back to the v7x-safe 48 MiB if the hardware query is unavailable.
    """
    try:
        cap = int(pltpu.get_tpu_info().vmem_capacity_bytes)
        return max(32 << 20, min((cap * 3) // 4, 112 << 20))
    except Exception:
        return 48 << 20


def _linear_kernel(x_ref, w_ref, b_ref, o_ref):
    # out[:, tile] = x @ W[:, tile] + b[tile]; activation cast done in-kernel.
    x = x_ref[...].astype(w_ref.dtype)
    acc = jnp.dot(x, w_ref[...], preferred_element_type=jnp.float32)
    o_ref[...] = (acc + b_ref[...]).astype(o_ref.dtype)


def _linear_int8_kernel(x_ref, w_ref, s_ref, b_ref, o_ref):
    # Dequantize the int8 weight tile in VMEM (VPU work, hidden under the HBM
    # bound), then f32 matmul-accumulate.
    w = w_ref[...].astype(jnp.float32) * s_ref[...]
    acc = jnp.dot(x_ref[...].astype(jnp.float32), w,
                  preferred_element_type=jnp.float32)
    o_ref[...] = (acc + b_ref[...]).astype(o_ref.dtype)


def prepare_face_recognition_params(weight, bias, param_dtype=jnp.float32):
    """One-time (init-time) parameter prep.

    weight: (C, E) in PyTorch nn.Linear layout; bias: (C,).
    param_dtype: jnp.float32, jnp.bfloat16, or jnp.int8 (per-column-scale quant).

    Picks the class-tile size `tn` from the per-generation VMEM budget, pads the
    class dim up to a multiple of `tn`, and stores the weight pre-transposed as
    (E, C_pad) so the forward pass never transposes, pads, or re-tiles in HBM.
    """
    weight = jnp.asarray(weight, jnp.float32)
    bias = jnp.asarray(bias, jnp.float32)
    C, E = weight.shape
    quantized = jnp.dtype(param_dtype) == jnp.dtype(jnp.int8)
    w_bytes = jnp.dtype(param_dtype).itemsize

    # ---- class-tile size from the per-chip VMEM budget ----------------------
    # ~55% of the budget goes to the double-buffered weight tiles; each single
    # weight DMA is additionally capped at ~16 MiB (well inside the multi-MiB
    # DMA sweet spot, leaves room for the x / out / bias buffers).
    budget = _vmem_budget_bytes()
    per_buf = min(int(0.55 * budget) // 2, 16 << 20)
    tn_max = max(_LANE, (per_buf // max(1, E * w_bytes)) // _LANE * _LANE)

    C128 = _round_up(C, _LANE)
    n_tiles = pl.cdiv(C128, tn_max)
    if C128 > _LANE:
        # >= 2 tiles gives DMA/compute overlap and lets the "parallel" class
        # axis span v7x's two TensorCores.
        n_tiles = max(n_tiles, 2)
    if n_tiles > 1 and n_tiles % 2 == 1:
        n_tiles += 1                       # even split across the 2 TCs
    tn = _round_up(pl.cdiv(C128, n_tiles), _LANE)
    C_pad = n_tiles * tn

    # ---- pre-transpose + pad (done once, at init) ----------------------------
    w_ec = weight.T                        # (E, C)
    if C_pad != C:
        w_ec = jnp.pad(w_ec, ((0, 0), (0, C_pad - C)))
        bias = jnp.pad(bias, (0, C_pad - C))

    params = {
        "b": bias.reshape(1, C_pad),       # f32
        "num_classes": C,
        "class_tile": int(tn),
        "is_int8": bool(quantized),
    }
    if quantized:
        absmax = jnp.max(jnp.abs(w_ec), axis=0, keepdims=True)        # (1, C_pad)
        scale = absmax / 127.0
        safe = jnp.where(scale > 0, scale, 1.0)
        params["w"] = jnp.clip(jnp.round(w_ec / safe), -127, 127).astype(jnp.int8)
        params["scale"] = scale.astype(jnp.float32)
    else:
        params["w"] = w_ec.astype(param_dtype)
    return params


def face_recognition_forward(x, params, batch_tile=256, trim=True):
    """x: (B, E). Returns (B, num_classes) f32 ((B, C_pad) if trim=False)."""
    w = params["w"]                        # (E, C_pad), pre-transposed at init
    b = params["b"]                        # (1, C_pad) f32
    C = params["num_classes"]
    tn = int(params["class_tile"])
    quantized = params["is_int8"]

    B, E = x.shape
    C_pad = w.shape[1]

    # Batch tile: a single block when B is small (block == full dim, so no (8,)
    # divisibility constraint); otherwise 8-aligned row tiles so the x / out
    # VMEM footprint stays bounded as B grows.
    tb = B if B <= batch_tile else max(8, (batch_tile // 8) * 8)

    x_bytes = jnp.dtype(x.dtype).itemsize
    w_bytes = jnp.dtype(w.dtype).itemsize
    budget = _vmem_budget_bytes()

    def footprint(tn_):
        f = 2 * (tb * E * x_bytes          # x tile (double-buffered)
                 + E * tn_ * w_bytes       # weight tile
                 + tn_ * 4                 # bias tile
                 + tb * tn_ * 4)           # f32 out tile
        if quantized:
            f += 2 * tn_ * 4               # per-column scale tile
        return f

    # Safety net only (tn was budget-sized at init): shrink to a smaller
    # lane-dense divisor of C_pad if x/out pressure pushes us over the budget.
    while footprint(tn) > budget and tn > _LANE:
        k = tn // _LANE - 1
        while k > 1 and C_pad % (k * _LANE) != 0:
            k -= 1
        tn = max(_LANE, k * _LANE)

    vmem_est = footprint(tn)
    vmem_limit = min(max(int(vmem_est * 1.25) + (4 << 20), 32 << 20), budget)
    vmem_limit = int(max(vmem_limit, vmem_est))   # never clamp below the estimate

    n_ct = C_pad // tn
    n_bt = pl.cdiv(B, tb)
    # Class tiles OUTER / batch tiles INNER: the weight block index is constant
    # along the inner axis, so each weight tile is DMA'd from HBM exactly once.
    grid = (n_ct, n_bt)

    if quantized:
        kernel = _linear_int8_kernel
        extra_in = [params["scale"]]
        extra_specs = [pl.BlockSpec((1, tn), lambda j, i: (0, j))]
    else:
        kernel = _linear_kernel
        extra_in = []
        extra_specs = []

    cost = pl.CostEstimate(
        flops=2 * B * E * C_pad,
        transcendentals=0,
        bytes_accessed=int(E * C_pad * w_bytes        # weight read once
                           + n_ct * B * E * x_bytes   # x re-read per class tile
                           + B * C_pad * 4            # output write
                           + C_pad * 4),              # bias
    )

    out = pl.pallas_call(
        kernel,
        out_shape=jax.ShapeDtypeStruct((B, C_pad), jnp.float32),
        grid_spec=pl.GridSpec(
            grid=grid,
            in_specs=[
                pl.BlockSpec((tb, E), lambda j, i: (i, 0)),    # x (small, re-streamed)
                pl.BlockSpec((E, tn), lambda j, i: (0, j)),    # weight tile (streamed once)
                *extra_specs,                                  # int8 per-column scale
                pl.BlockSpec((1, tn), lambda j, i: (0, j)),    # bias tile
            ],
            out_specs=pl.BlockSpec((tb, tn), lambda j, i: (i, j)),
        ),
        compiler_params=pltpu.CompilerParams(
            dimension_semantics=("parallel", "parallel"),
            vmem_limit_bytes=vmem_limit,
        ),
        cost_estimate=cost,
    )(x, w, *extra_in, b)

    # Consumers that tolerate the lane-padded head can pass trim=False and skip
    # this extra HBM pass over the output.
    return out[:, :C] if (trim and C_pad != C) else out


if __name__ == "__main__":
    # Shapes consistent with the module: batch=8, embedding_size=32,
    # num_classes=16 (padded internally to one 128-lane class tile).
    B, E, C = 8, 32, 16

    key = jax.random.PRNGKey(0)
    kx, kw, kb = jax.random.split(key, 3)

    x = jax.random.normal(kx, (B, E), dtype=jnp.float32)
    # Deterministic init mimicking nn.Linear default (uniform +/- 1/sqrt(E)).
    bound = 1.0 / math.sqrt(E)
    weight = jax.random.uniform(kw, (C, E), dtype=jnp.float32,
                                minval=-bound, maxval=bound)
    bias = jax.random.uniform(kb, (C,), dtype=jnp.float32,
                              minval=-bound, maxval=bound)

    ref = x @ weight.T + bias

    # f32 weights: strict check against torch.nn.Linear semantics.
    params_f32 = prepare_face_recognition_params(weight, bias, jnp.float32)
    out = jax.block_until_ready(face_recognition_forward(x, params_f32))
    assert out.shape == (B, C)
    assert jnp.allclose(out, ref, atol=1e-5, rtol=1e-5)

    # bf16 weight storage (activations cast in-kernel; f32 accumulation).
    params_bf16 = prepare_face_recognition_params(weight, bias, jnp.bfloat16)
    out_bf16 = jax.block_until_ready(face_recognition_forward(x, params_bf16))
    w_rt = params_bf16["w"][:, :C].astype(jnp.float32)       # bf16-rounded weight
    x_rt = x.astype(jnp.bfloat16).astype(jnp.float32)        # bf16-rounded activations
    ref_bf16 = x_rt @ w_rt + bias
    assert out_bf16.shape == (B, C)
    assert jnp.allclose(out_bf16, ref_bf16, atol=1e-3, rtol=1e-3)

    # int8 weight storage with per-column scale, dequantized in-kernel
    # (bandwidth-optimal on v5e/v6e; the dequant is free VPU filler).
    params_i8 = prepare_face_recognition_params(weight, bias, jnp.int8)
    out_i8 = jax.block_until_ready(face_recognition_forward(x, params_i8))
    w_dq = (params_i8["w"].astype(jnp.float32) * params_i8["scale"])[:, :C]
    ref_i8 = x @ w_dq + bias
    assert out_i8.shape == (B, C)
    assert jnp.allclose(out_i8, ref_i8, atol=2e-3, rtol=2e-3)

    print("KERNEL_OK")
</pallas_src>

<mosaic_0001>
module attributes {stable_mosaic.version = 11 : i64} {
  func.func @_linear_kernel(%arg0: i32, %arg1: i32, %arg2: memref<8x32xf32, #tpu.memory_space<vmem>>, %arg3: memref<32x128xf32, #tpu.memory_space<vmem>>, %arg4: memref<1x128xf32, #tpu.memory_space<vmem>>, %arg5: memref<8x128xf32, #tpu.memory_space<vmem>>) attributes {dimension_semantics = [#tpu.dimension_semantics<parallel>, #tpu.dimension_semantics<parallel>], iteration_bounds = array<i64: 1, 1>, scalar_prefetch = 0 : i64, scratch_operands = 0 : i64, tpu.core_type = #tpu.core_type<tc>, window_params = [{transform_indices = @transform_0, window_bounds = array<i64: 8, 32>}, {transform_indices = @transform_1, window_bounds = array<i64: 32, 128>}, {transform_indices = @transform_2, window_bounds = array<i64: 1, 128>}, {transform_indices = @transform_3, window_bounds = array<i64: 8, 128>}]} {
    %c0 = arith.constant 0 : index
    %c0_0 = arith.constant 0 : index
    %0 = vector.load %arg2[%c0, %c0_0] : memref<8x32xf32, #tpu.memory_space<vmem>>, vector<8x32xf32>
    %c0_1 = arith.constant 0 : index
    %c0_2 = arith.constant 0 : index
    %1 = vector.load %arg3[%c0_1, %c0_2] : memref<32x128xf32, #tpu.memory_space<vmem>>, vector<32x128xf32>
    %cst = arith.constant dense<0.000000e+00> : vector<8x128xf32>
    %2 = tpu.matmul %0, %1, %cst {dimension_numbers = #tpu.dot_dimension_numbers<[1], [0], [0], [1], [0, 0, 1, 1], [], []>} : vector<8x32xf32>, vector<32x128xf32>, vector<8x128xf32> -> vector<8x128xf32>
    %c0_3 = arith.constant 0 : index
    %c0_4 = arith.constant 0 : index
    %3 = vector.load %arg4[%c0_3, %c0_4] : memref<1x128xf32, #tpu.memory_space<vmem>>, vector<1x128xf32>
    %4 = vector.broadcast %3 : vector<1x128xf32> to vector<8x128xf32>
    %5 = arith.addf %2, %4 : vector<8x128xf32>
    %c0_5 = arith.constant 0 : index
    %c0_6 = arith.constant 0 : index
    %6 = vector.load %arg5[%c0_5, %c0_6] : memref<8x128xf32, #tpu.memory_space<vmem>>, vector<8x128xf32>
    tpu.vector_store %arg5[%c0_5, %c0_6], %5 {strides = array<i32>} : memref<8x128xf32, #tpu.memory_space<vmem>>, vector<8x128xf32>,
    return
  }
  func.func @transform_0(%arg0: i32, %arg1: i32) -> (i32, i32) {
    %c0_i32 = arith.constant 0 : i32
    %c0_i32_0 = arith.constant 0 : i32
    return %arg1, %c0_i32 : i32, i32
  }
  func.func @transform_1(%arg0: i32, %arg1: i32) -> (i32, i32) {
    %c0_i32 = arith.constant 0 : i32
    %c0_i32_0 = arith.constant 0 : i32
    return %c0_i32, %arg0 : i32, i32
  }
  func.func @transform_2(%arg0: i32, %arg1: i32) -> (i32, i32) {
    %c0_i32 = arith.constant 0 : i32
    %c0_i32_0 = arith.constant 0 : i32
    return %c0_i32, %arg0 : i32, i32
  }
  func.func @transform_3(%arg0: i32, %arg1: i32) -> (i32, i32) {
    %c0_i32 = arith.constant 0 : i32
    return %arg1, %arg0 : i32, i32
  }
}

</mosaic_0001>

<bundles_post_ra>
// kernel: tpu_custom_call.1
= control target key start
LH: loop header
LB: loop body
LE: loop exit
PB: predicated region body
PF: predicated region fallthrough
CT: control target
= control target key end

     0   :  { %8 = vsyncpa [#allocation3], 0  ;;  %s322_s0 = inlined_call_operand.hbm [shape: f32[8,32], index: 0, kind: input, shape index: {}]   ;;  %s323_s1 = inlined_call_operand.hbm [shape: f32[32,128], index: 1, kind: input, shape index: {}]   ;;  %s324_s2 = inlined_call_operand.vmem [shape: f32[1,128], index: 2, kind: input, shape index: {}]   ;;  %s325_s3 = inlined_call_operand.hbm [shape: f32[8,128], index: 3, kind: output, shape index: {}]  }
   0x1   :  { %9 = vsyncpa [#allocation6], 0 }
   0x2   :  { %10 = vsyncpa [#allocation4], 0  ;;  %s248_s12 = smov [#allocation2]   ;;  %s249_s14 = smov [#allocation5]  }
   0x3   :  { %s17_s13 = sshll.u32 %s248_s12, 4  ;;  %s26_s15 = sshll.u32 %s249_s14, 4  ;;  %s18_s13 = int_to_ptr.vmem [resolvable:$true] %s17_s13  ;;  %s276_s15 = int_to_ptr.vmem [resolvable:$true] %s26_s15 }
   0x4   :  { %s176_s18 = scalar_lea.hbm %s322_s0, 128 }
   0x5   :  { %p177_p0 = scmp.ne.s32.totalorder %s322_s0, %s176_s18  ;;  %p180_p1 = scmp.lt.u32.totalorder %s176_s18, %s322_s0 }
   0x7   :  { %p182_p2 = pnand %p180_p1, %p177_p0 }
   0x9   :  { %185 = shalt.err (!%p182_p2)
}
   0xa   :  { %s186_s23 = scalar_lea.vmem %s18_s13, 128  ;;  %p191_p4 = scmp.lt.s32.totalorder %s18_s13, %s18_s13 }
   0xb   :  { %p187_p3 = scmp.ne.s32.totalorder %s18_s13, %s186_s23  ;;  %p192_p5 = scmp.lt.s32.totalorder %s186_s23, %s186_s23 }
   0xd   :  { %p193_p6 = por %p192_p5, %p191_p4 }
   0xf   :  { %p194_p7 = pnand %p193_p6, %p187_p3 }
  0x11   :  { %197 = shalt.err (!%p194_p7)
}
  0x12   :  { %20 = dma.hbm_to_vmem [thread:$0]  %s322_s0, 128, %s18_s13, [#allocation3]  }
  0x13   :  { %s198_s28 = scalar_lea.hbm %s323_s1, 512 }
  0x14   :  { %p199_p8 = scmp.ne.s32.totalorder %s323_s1, %s198_s28  ;;  %p202_p9 = scmp.lt.u32.totalorder %s198_s28, %s323_s1 }
  0x16   :  { %p204_p10 = pnand %p202_p9, %p199_p8 }
  0x18   :  { %207 = shalt.err (!%p204_p10)
}
  0x19   :  { %s208_s6 = scalar_lea.vmem %s276_s15, 512  ;;  %p213_p12 = scmp.lt.s32.totalorder %s276_s15, %s276_s15 }
  0x1a   :  { %p209_p11 = scmp.ne.s32.totalorder %s276_s15, %s208_s6  ;;  %p214_p13 = scmp.lt.s32.totalorder %s208_s6, %s208_s6 }
  0x1c   :  { %p215_p0 = por %p214_p13, %p213_p12 }
  0x1e   :  { %p216_p1 = pnand %p215_p0, %p209_p11 }
  0x20   :  { %219 = shalt.err (!%p216_p1)
}
  0x21   :  { %s250_s0 = smov 128   ;;  %s251_s7 = smov 8  }
  0x22   :  { %32 = dma.hbm_to_vmem [thread:$0]  %s323_s1, 512, %s276_s15, [#allocation6], %s250_s0, %s250_s0, %s251_s7  }
  0x23   :  { %242 = dma.done.wait [#allocation3], 128  }
  0x24   :  { %243 = vsyncadd [#allocation3], 4294967168 }
  0x25   :  { %244 = dma.done.wait [#allocation6], 512  }
  0x26   :  { %245 = vsyncadd [#allocation6], 4294966784  ;;  %v252_v0 = vmov 0.0|0.0   ;;  %vm253_vm0 = vmmov 0   ;;  %v254_v1 = vmov 0.0   ;;  %v42_v2 = vld [vmem:[#allocation5] sm:$0xff] }
  0x27   :  { %162 = vmatprep.subr.bf16.mxu0 %v252_v0  ;;  %159 = vmatprep.mubr.msk.f32.mxu0 %vm253_vm0, %v254_v1  ;;  %v43_v3 = vld [vmem:[#allocation5 + $0x8] sm:$0xff]  ;;  %v44_v4 = vld [vmem:[#allocation5 + $0x10] sm:$0xff]  ;;  %v45_v6 = vld [vmem:[#allocation5 + $0x18] sm:$0xff]  ;;  %vm53_vm1 = vcmask 261120   ;;  %s255_s11 = smov [#allocation7]  }
  0x28   :  { %v163_v5 = vpack.c.bf16 %v43_v3, %v42_v2  ;;  %v166_v7 = vpack.c.bf16 %v45_v6, %v44_v4  ;;  %v41_v8 = vld [vmem:[#allocation2] sm:$0xff]  ;;  %s134_s12 = sshll.u32 %s255_s11, 4  ;;  %s135_s12 = int_to_ptr.vmem [resolvable:$true] %s134_s12 }
  0x29   :  { %v144_v9 = vld [vmem:[%s324_s2] ss:$0 sm:$0xff]  ;;  %s220_s13 = scalar_lea.vmem %s135_s12, 128  ;;  %p225_p3 = scmp.lt.s32.totalorder %s135_s12, %s135_s12 }
  0x2a   :  { %164 = vmatpush3.bf16.msra.mxu0 %v163_v5  ;;  %p221_p2 = scmp.ne.s32.totalorder %s135_s12, %s220_s13  ;;  %p226_p4 = scmp.lt.s32.totalorder %s220_s13, %s220_s13 }
  0x2b   :  { %165 = vmatprep.subr.bf16.mxu0 %v252_v0 }
  0x2c   :  { %p227_p5 = por %p226_p4, %p225_p3 }
  0x2e   :  { %167 = vmatpush3.bf16.msra.mxu0 %v166_v7  ;;  %p228_p6 = pnand %p227_p5, %p221_p2 }
  0x31   :  { %160 = vmatmul.mubr.msk.f32.vlgmr.msra.gmra.mrb[0].mxu0 %vm53_vm1, %v41_v8 }
 0x104   :  { %v123_v10 = vpop.f32.mrb[0].mxu0 }
 0x105   :  { %v124_v11 = vadd.f32 %v144_v9, %v123_v10  ;;  %v161_v12 = vpop.f32.mrb[1].mxu0 }
 0x107   :  { %127 = vst [vmem:[#allocation7] sm:$0xff] %v124_v11 }
 0x108   :  { %231 = shalt.err (!%p228_p6)
}
 0x109   :  { %s232_s16 = scalar_lea.hbm %s325_s3, 128 }
 0x10a   :  { %p233_p7 = scmp.ne.s32.totalorder %s325_s3, %s232_s16  ;;  %p236_p8 = scmp.lt.u32.totalorder %s232_s16, %s325_s3 }
 0x10c   :  { %p238_p9 = pnand %p236_p8, %p233_p7 }
 0x10e   :  { %241 = shalt.err (!%p238_p9)
}
 0x10f   :  { %137 = dma.vmem_to_hbm [thread:$0]  %s135_s12, 128, %s325_s3, [#allocation4]  }
 0x110   :  { %246 = dma.done.wait [#allocation4], 128  }
 0x111   :  { %247 = vsyncadd [#allocation4], 4294967168 }
 0x112   :  { %141 = vsyncpa [#allocation3], 1 }
 0x113   :  { %142 = vsyncpa [#allocation6], 1 }
 0x114   :  { %143 = vsyncpa [#allocation4], 1 }

</bundles_post_ra>
